<compile_context>
chip_gen: v6e
topology: v6e:2x2x1
jax: 0.10.0
libtpu: 0.0.40
codegen_flags: <defaults>
</compile_context>

<pallas_src>
import jax
import jax.numpy as jnp
from jax.experimental import pallas as pl
from jax.experimental.pallas import tpu as pltpu

IN_F, HID_F, OUT_F = 10, 20, 5
TILE_B_MAX = 4096  # lane-axis (batch) tile; VMEM footprint is tiny even at 4096


def _round_up(x, m):
    return ((x + m - 1) // m) * m


def mlp_kernel(xT_ref, w1_ref, b1_ref, w2_ref, b2_ref, oT_ref):
    # Batch-on-lanes: xT is (IN_F, TILE_B). Weights kept in PyTorch (out, in) layout,
    # so h^T = W1 @ x^T and y^T = W2 @ h^T. Both matmuls + bias + ReLU fused in-kernel.
    h = jnp.dot(w1_ref[...], xT_ref[...], preferred_element_type=jnp.float32)
    h = jnp.maximum(h + b1_ref[...], 0.0)                        # (HID_F, TILE_B) f32
    y = jnp.dot(w2_ref[...], h.astype(w2_ref.dtype),
                preferred_element_type=jnp.float32)              # bf16 MXU, f32 accum
    oT_ref[...] = (y + b2_ref[...]).astype(oT_ref.dtype)         # (OUT_F, TILE_B)


def simple_model_forward(x, w1, b1, w2, b2):
    """y = relu(x @ w1.T + b1) @ w2.T + b2 with PyTorch-layout weights (out, in)."""
    B = x.shape[0]
    tile_b = min(TILE_B_MAX, _round_up(B, 128))
    B_pad = _round_up(B, tile_b)

    # Batch-on-lanes + bf16 streaming input; pad batch so the grid divides exactly.
    x_pad = jnp.pad(x, ((0, B_pad - B), (0, 0)))
    xT = x_pad.T.astype(jnp.bfloat16)                  # (IN_F, B_pad)
    w1b = w1.astype(jnp.bfloat16)                      # (HID_F, IN_F)
    w2b = w2.astype(jnp.bfloat16)                      # (OUT_F, HID_F)
    b1c = b1.reshape(HID_F, 1).astype(jnp.float32)
    b2c = b2.reshape(OUT_F, 1).astype(jnp.float32)

    grid = (B_pad // tile_b,)
    yT = pl.pallas_call(
        mlp_kernel,
        out_shape=jax.ShapeDtypeStruct((OUT_F, B_pad), jnp.float32),
        grid=grid,
        in_specs=[
            pl.BlockSpec((IN_F, tile_b), lambda i: (0, i)),    # stream x^T batch tiles
            pl.BlockSpec((HID_F, IN_F), lambda i: (0, 0)),     # weights resident in VMEM
            pl.BlockSpec((HID_F, 1), lambda i: (0, 0)),
            pl.BlockSpec((OUT_F, HID_F), lambda i: (0, 0)),
            pl.BlockSpec((OUT_F, 1), lambda i: (0, 0)),
        ],
        out_specs=pl.BlockSpec((OUT_F, tile_b), lambda i: (0, i)),
        compiler_params=pltpu.CompilerParams(
            dimension_semantics=("parallel",),  # v7x: shard batch tiles across both TCs
        ),
    )(xT, w1b, b1c, w2b, b2c)

    return yT[:, :B].T  # back to (B, OUT_F)


if __name__ == "__main__":
    B = 8
    kx, k1, k2, k3, k4 = jax.random.split(jax.random.PRNGKey(0), 5)
    x = jax.random.normal(kx, (B, IN_F), jnp.float32)

    # PyTorch-style default init: Uniform(-1/sqrt(fan_in), 1/sqrt(fan_in)), (out, in) layout.
    lim1 = 1.0 / jnp.sqrt(float(IN_F))
    lim2 = 1.0 / jnp.sqrt(float(HID_F))
    w1 = jax.random.uniform(k1, (HID_F, IN_F), jnp.float32, -lim1, lim1)
    b1 = jax.random.uniform(k2, (HID_F,), jnp.float32, -lim1, lim1)
    w2 = jax.random.uniform(k3, (OUT_F, HID_F), jnp.float32, -lim2, lim2)
    b2 = jax.random.uniform(k4, (OUT_F,), jnp.float32, -lim2, lim2)

    out = jax.block_until_ready(simple_model_forward(x, w1, b1, w2, b2))

    # Pure-JAX f32 reference (bf16 streaming => looser tolerance than 1e-5).
    ref = jnp.maximum(x @ w1.T + b1, 0.0) @ w2.T + b2
    assert out.shape == (B, OUT_F), out.shape
    assert jnp.allclose(out, ref, atol=3e-2, rtol=3e-2), "mismatch vs reference"

    print("KERNEL_OK")
</pallas_src>

<mosaic_0001>
module attributes {stable_mosaic.version = 11 : i64} {
  func.func @mlp_kernel(%arg0: i32, %arg1: memref<10x128xbf16, #tpu.memory_space<vmem>>, %arg2: memref<20x10xbf16, #tpu.memory_space<vmem>>, %arg3: memref<20x1xf32, #tpu.memory_space<vmem>>, %arg4: memref<5x20xbf16, #tpu.memory_space<vmem>>, %arg5: memref<5x1xf32, #tpu.memory_space<vmem>>, %arg6: memref<5x128xf32, #tpu.memory_space<vmem>>) attributes {dimension_semantics = [#tpu.dimension_semantics<parallel>], iteration_bounds = array<i64: 1>, scalar_prefetch = 0 : i64, scratch_operands = 0 : i64, tpu.core_type = #tpu.core_type<tc>, window_params = [{transform_indices = @transform_0, window_bounds = array<i64: 10, 128>}, {pipeline_mode = #tpu.pipeline_mode<synchronous>, transform_indices = @transform_1, window_bounds = array<i64: 20, 10>}, {pipeline_mode = #tpu.pipeline_mode<synchronous>, transform_indices = @transform_2, window_bounds = array<i64: 20, 1>}, {pipeline_mode = #tpu.pipeline_mode<synchronous>, transform_indices = @transform_3, window_bounds = array<i64: 5, 20>}, {pipeline_mode = #tpu.pipeline_mode<synchronous>, transform_indices = @transform_4, window_bounds = array<i64: 5, 1>}, {transform_indices = @transform_5, window_bounds = array<i64: 5, 128>}]} {
    %c0 = arith.constant 0 : index
    %c0_0 = arith.constant 0 : index
    %0 = vector.load %arg2[%c0, %c0_0] : memref<20x10xbf16, #tpu.memory_space<vmem>>, vector<20x10xbf16>
    %c0_1 = arith.constant 0 : index
    %c0_2 = arith.constant 0 : index
    %1 = vector.load %arg1[%c0_1, %c0_2] : memref<10x128xbf16, #tpu.memory_space<vmem>>, vector<10x128xbf16>
    %cst = arith.constant dense<0.000000e+00> : vector<20x128xf32>
    %2 = tpu.matmul %0, %1, %cst {dimension_numbers = #tpu.dot_dimension_numbers<[1], [0], [0], [1], [0, 0, 1, 1], [], []>} : vector<20x10xbf16>, vector<10x128xbf16>, vector<20x128xf32> -> vector<20x128xf32>
    %c0_3 = arith.constant 0 : index
    %c0_4 = arith.constant 0 : index
    %3 = vector.load %arg3[%c0_3, %c0_4] : memref<20x1xf32, #tpu.memory_space<vmem>>, vector<20x1xf32>
    %4 = vector.broadcast %3 : vector<20x1xf32> to vector<20x128xf32>
    %5 = arith.addf %2, %4 : vector<20x128xf32>
    %cst_5 = arith.constant 0.000000e+00 : f32
    %6 = vector.broadcast %cst_5 : f32 to vector<20x128xf32>
    %7 = arith.maximumf %5, %6 : vector<20x128xf32>
    %c0_6 = arith.constant 0 : index
    %c0_7 = arith.constant 0 : index
    %8 = vector.load %arg4[%c0_6, %c0_7] : memref<5x20xbf16, #tpu.memory_space<vmem>>, vector<5x20xbf16>
    %9 = arith.truncf %7 : vector<20x128xf32> to vector<20x128xbf16>
    %cst_8 = arith.constant dense<0.000000e+00> : vector<5x128xf32>
    %10 = tpu.matmul %8, %9, %cst_8 {dimension_numbers = #tpu.dot_dimension_numbers<[1], [0], [0], [1], [0, 0, 1, 1], [], []>} : vector<5x20xbf16>, vector<20x128xbf16>, vector<5x128xf32> -> vector<5x128xf32>
    %c0_9 = arith.constant 0 : index
    %c0_10 = arith.constant 0 : index
    %11 = vector.load %arg5[%c0_9, %c0_10] : memref<5x1xf32, #tpu.memory_space<vmem>>, vector<5x1xf32>
    %12 = vector.broadcast %11 : vector<5x1xf32> to vector<5x128xf32>
    %13 = arith.addf %10, %12 : vector<5x128xf32>
    %c0_11 = arith.constant 0 : index
    %c0_12 = arith.constant 0 : index
    %14 = vector.load %arg6[%c0_11, %c0_12] : memref<5x128xf32, #tpu.memory_space<vmem>>, vector<5x128xf32>
    tpu.vector_store %arg6[%c0_11, %c0_12], %13 {strides = array<i32>} : memref<5x128xf32, #tpu.memory_space<vmem>>, vector<5x128xf32>,
    return
  }
  func.func @transform_0(%arg0: i32) -> (i32, i32) {
    %c0_i32 = arith.constant 0 : i32
    %c0_i32_0 = arith.constant 0 : i32
    return %c0_i32, %arg0 : i32, i32
  }
  func.func @transform_1(%arg0: i32) -> (i32, i32) {
    %c0_i32 = arith.constant 0 : i32
    %c0_i32_0 = arith.constant 0 : i32
    %c0_i32_1 = arith.constant 0 : i32
    return %c0_i32, %c0_i32_0 : i32, i32
  }
  func.func @transform_2(%arg0: i32) -> (i32, i32) {
    %c0_i32 = arith.constant 0 : i32
    %c0_i32_0 = arith.constant 0 : i32
    %c0_i32_1 = arith.constant 0 : i32
    return %c0_i32, %c0_i32_0 : i32, i32
  }
  func.func @transform_3(%arg0: i32) -> (i32, i32) {
    %c0_i32 = arith.constant 0 : i32
    %c0_i32_0 = arith.constant 0 : i32
    %c0_i32_1 = arith.constant 0 : i32
    return %c0_i32, %c0_i32_0 : i32, i32
  }
  func.func @transform_4(%arg0: i32) -> (i32, i32) {
    %c0_i32 = arith.constant 0 : i32
    %c0_i32_0 = arith.constant 0 : i32
    %c0_i32_1 = arith.constant 0 : i32
    return %c0_i32, %c0_i32_0 : i32, i32
  }
  func.func @transform_5(%arg0: i32) -> (i32, i32) {
    %c0_i32 = arith.constant 0 : i32
    %c0_i32_0 = arith.constant 0 : i32
    return %c0_i32, %arg0 : i32, i32
  }
}

</mosaic_0001>

<bundles_post_ra>
// kernel: tpu_custom_call.1
= control target key start
LH: loop header
LB: loop body
LE: loop exit
PB: predicated region body
PF: predicated region fallthrough
CT: control target
= control target key end

     0   :  { %vm65_vm0 = vcmask 1044480   ;;  %vm58_vm1 = vcmask 80896   ;;  %v250_v6 = vmov 0   ;;  %s311_s0 = inlined_call_operand.vmem [shape: bf16[10,128], index: 0, kind: input, shape index: {}]   ;;  %s312_s1 = inlined_call_operand.vmem [shape: bf16[20,10], index: 1, kind: input, shape index: {}]   ;;  %s313_s2 = inlined_call_operand.vmem [shape: f32[20,1], index: 2, kind: input, shape index: {}]   ;;  %s314_s3 = inlined_call_operand.vmem [shape: bf16[5,20], index: 3, kind: input, shape index: {}]   ;;  %s315_s4 = inlined_call_operand.vmem [shape: f32[5,1], index: 4, kind: input, shape index: {}]   ;;  %s316_s5 = inlined_call_operand.hbm [shape: f32[5,128], index: 5, kind: output, shape index: {}]  }
   0x1   :  { %v225_v0 = vld [vmem:[%s311_s0] sm:$0x1f]   ;;  %v227_v3 = vld [vmem:[%s312_s1 + $0x8] ss:$0 sps:$4 sm:$0x33]   ;;  %223 = vset.pattern.permute.xlu0 %v250_v6  ;;  %224 = vset.pattern.permute.xlu1 %v250_v6 }
   0x2   :  { %v226_v1 = vld [vmem:[%s312_s1] sm:$0xff]   ;;  %218 = vmatprep.subr.msk.bf16.mxu0 %vm65_vm0, %v225_v0  ;;  %v67_v2 = vsel %vm65_vm0, %v225_v0, 0  ;;  %v29_v4 = vld [vmem:[%s313_s2 + $0x10] sm:$0xf]  ;;  %v28_v5 = vld [vmem:[%s313_s2 + $0x8] sm:$0xff] }
   0x3   :  { %205 = vmatpush3.bf16.msra.mxu0 %v67_v2  ;;  %206 = vmatprep.mubr.msk.bf16.mxu0 %vm58_vm1, %v226_v1 }
   0x4   :  { %10 = vsyncpa [#allocation3], 0  ;;  %42 = vperm.xlu0 %223, %v29_v4   ;;  %37 = vperm.xlu1 %224, %v28_v5   ;;  %v27_v7 = vld [vmem:[%s313_s2] sm:$0xff]  ;;  %v251_v9 = vmov 0.0   ;;  %vm252_vm2 = vmmov 0   ;;  %vm133_vm3 = vcmask 1041408  }
   0x5   :  { %v123_v8 = vld [vmem:[%s315_s4] sm:$0x1f]  ;;  %210 = vmatprep.subr.bf16.mxu1 %v251_v9  ;;  %214 = vmatprep.mubr.msk.bf16.mxu1 %vm252_vm2, %v251_v9  ;;  %vm129_vm4 = vcmask 162816   ;;  %s253_s30 = smov [#allocation2]  }
   0x6   :  { %207 = vmatmul.mubr.msk.bf16.vlgmr.msra.gmra.mxu0 %vm58_vm1, %v227_v3  ;;  %v120_v26 = vld [vmem:[%s314_s3] sm:$0x7]  ;;  %s184_s6 = sshll.u32 %s253_s30, 4  ;;  %s185_s6 = int_to_ptr.vmem [resolvable:$true] %s184_s6 }
   0x7   :  { %s228_s7 = scalar_lea.vmem %s185_s6, 128  ;;  %p233_p1 = scmp.lt.s32.totalorder %s185_s6, %s185_s6 }
   0x8   :  { %32 = vperm.xlu0 %223, %v27_v7   ;;  %126 = vperm.xlu1 %224, %v123_v8   ;;  %p229_p0 = scmp.ne.s32.totalorder %s185_s6, %s228_s7  ;;  %p234_p2 = scmp.lt.s32.totalorder %s228_s7, %s228_s7 }
   0xa   :  { %p235_p3 = por %p234_p2, %p233_p1 }
   0xc   :  { %p236_p4 = pnand %p235_p3, %p229_p0 }
  0x7f   :  { %v43_v10 = vpop.permute.xlu0 %42  ;;  %v38_v19 = vpop.permute.xlu1 %37 }
  0x83   :  { %v33_v13 = vpop.permute.xlu0 %32  ;;  %v127_v27 = vpop.permute.xlu1 %126 }
  0xc6   :  { %v208_v11 = vpop.f32.mrf.mxu0 }
  0xc7   :  { %v112_v12 = vadd.f32 %v208_v11, %v43_v10 }
  0xc8   :  { %v103_v14 = vpop.f32.mrf.mxu0 }
  0xc9   :  { %v119_v15 = vmax.f32 %v112_v12, 0.0  ;;  %v104_v18 = vadd.f32 %v103_v14, %v33_v13 }
  0xca   :  { %v209_v16 = vpop.f32.mrf.mxu0 }
  0xcb   :  { %v122_v17 = vpack.c.bf16 %v119_v15, %v119_v15  ;;  %v117_v23 = vmax.f32 %v104_v18, 0.0 }
  0xcc   :  { %v106_v20 = vpop.f32.mrf.mxu0 }
  0xcd   :  { %v107_v21 = vadd.f32 %v106_v20, %v38_v19  ;;  %v135_v22 = vsel %vm133_vm3, %v122_v17, 0 }
  0xce   :  { %211 = vmatpush3.bf16.msra.mxu1 %v135_v22 }
  0xcf   :  { %v118_v24 = vmax.f32 %v107_v21, 0.0  ;;  %212 = vmatprep.subr.bf16.mxu1 %v251_v9 }
  0xd1   :  { %v121_v25 = vpack.c.bf16 %v118_v24, %v117_v23 }
  0xd3   :  { %213 = vmatpush3.bf16.msra.mxu1 %v121_v25 }
  0xd6   :  { %215 = vmatmul.mubr.msk.bf16.vlgmr.msra.gmra.mxu1 %vm129_vm4, %v120_v26 }
 0x196   :  { %v171_v28 = vpop.f32.mrf.mxu1 }
 0x197   :  { %v172_v29 = vadd.f32 %v171_v28, %v127_v27 }
 0x198   :  { %v216_v30 = vpop.f32.mrf.mxu1 }
 0x199   :  { %177 = vst [vmem:[#allocation2] sm:$0x1f] %v172_v29 }
 0x19a   :  { %v174_v31 = vpop.f32.mrf.mxu1 }
 0x19b   :  { %239 = shalt.err (!%p236_p4)
}
 0x19c   :  { %187 = dma.vmem_to_hbm [thread:$0]  %s185_s6, 128, %s316_s5, [#allocation3]   ;;  %v217_v32 = vpop.f32.mrf.mxu1 }
 0x19d   :  { %248 = dma.done.wait [#allocation3], 128  }
 0x19e   :  { %249 = vsyncadd [#allocation3], 4294967168 }
 0x19f   :  { %191 = vsyncpa [#allocation3], 1 }

</bundles_post_ra>
